<compile_context>
chip_gen: v7x
topology: tpu7x:2x2x1
jax: 0.10.0
libtpu: 0.0.40
codegen_flags: <defaults>
</compile_context>

<pallas_src>
import jax
import jax.numpy as jnp
from jax.experimental import pallas as pl
from jax.experimental.pallas import tpu as pltpu


def fdecoder_kernel(feat_ref, finfo_ref,
                    w1_ref, b1_ref,
                    w2_ref, b2_ref,
                    w3a_ref, w3b_ref, b3_ref,
                    out_ref):
    # decoder1: Linear(feat_dim, 256) + ReLU  (MXU, f32 accumulate)
    h1 = jnp.dot(feat_ref[...], w1_ref[...],
                 preferred_element_type=jnp.float32) + b1_ref[...]
    h1 = jnp.maximum(h1, 0.0)

    # decoder1: Linear(256, 128) + ReLU  (MXU, f32 accumulate)
    h2 = jnp.dot(h1.astype(w2_ref.dtype), w2_ref[...],
                 preferred_element_type=jnp.float32) + b2_ref[...]
    h2 = jnp.maximum(h2, 0.0)

    # decoder2: Linear(131, 2) on concat([h2, finfo], dim=1), as split matmul.
    out = jnp.dot(h2, w3a_ref[...], preferred_element_type=jnp.float32) + b3_ref[...]

    # (B,3) @ (3,2) term as three VPU broadcast-FMAs (avoids a degenerate MXU tile).
    f = finfo_ref[...].astype(jnp.float32)
    w3b = w3b_ref[...]
    out = out + f[:, 0:1] * w3b[0:1, :]
    out = out + f[:, 1:2] * w3b[1:2, :]
    out = out + f[:, 2:3] * w3b[2:3, :]

    out_ref[...] = out.astype(out_ref.dtype)


def fdecoder_forward(feat, finfo, params, *, tile_b=None, use_bf16=False):
    """feat: (B, feat_dim) f32, finfo: (B, 3) f32 -> (B, 2) f32."""
    B, feat_dim = feat.shape
    w1, b1, w2, b2, w3, b3 = (params["w1"], params["b1"],
                              params["w2"], params["b2"],
                              params["w3"], params["b3"])
    # Split decoder2 weight into the h2-part and the finfo-part (exact).
    w3a = w3[:128, :]   # (128, 2)
    w3b = w3[128:, :]   # (3, 2)
    b1_2d = b1.reshape(1, -1)
    b2_2d = b2.reshape(1, -1)
    b3_2d = b3.reshape(1, -1)

    if use_bf16:
        # Halve the dominant HBM traffic (w1 + feat); accumulation stays f32 on the MXU.
        feat = feat.astype(jnp.bfloat16)
        w1 = w1.astype(jnp.bfloat16)
        w2 = w2.astype(jnp.bfloat16)
    in_bytes = 2 if use_bf16 else 4

    # Batch tile: multiple of 8; large enough to fill MXU rows at big B, small enough
    # that double-buffered feat tiles + resident weights stay well inside v7x's 64 MiB.
    if tile_b is None:
        tile_b = 512 if B >= 512 else ((B + 7) // 8) * 8
    tile_b = max(8, (tile_b // 8) * 8)

    B_pad = ((B + tile_b - 1) // tile_b) * tile_b
    if B_pad != B:
        feat = jnp.pad(feat, ((0, B_pad - B), (0, 0)))
        finfo = jnp.pad(finfo, ((0, B_pad - B), (0, 0)))

    grid = (B_pad // tile_b,)

    weight_bytes = ((feat_dim * 256 + 256 * 128) * in_bytes
                    + (256 + 128 + 3 * 2 + 2) * 4)
    io_bytes = B_pad * (feat_dim * in_bytes + (3 + 2) * 4)
    cost = pl.CostEstimate(
        flops=2 * B_pad * (feat_dim * 256 + 256 * 128 + 128 * 2 + 3 * 2),
        transcendentals=0,
        bytes_accessed=weight_bytes + io_bytes,
    )

    # Resident weights + double-buffered per-tile I/O, with 2x headroom for scratch.
    tile_io_bytes = 2 * tile_b * (feat_dim * in_bytes + (3 + 2) * 4)
    vmem_limit = int(min(48 * 2**20, max(32 * 2**20, 2 * (weight_bytes + tile_io_bytes))))

    out = pl.pallas_call(
        fdecoder_kernel,
        out_shape=jax.ShapeDtypeStruct((B_pad, 2), jnp.float32),
        grid=grid,
        in_specs=[
            pl.BlockSpec((tile_b, feat_dim), lambda i: (i, 0)),  # feat   (per batch tile)
            pl.BlockSpec((tile_b, 3),        lambda i: (i, 0)),  # finfo  (per batch tile)
            pl.BlockSpec((feat_dim, 256),    lambda i: (0, 0)),  # w1     (resident)
            pl.BlockSpec((1, 256),           lambda i: (0, 0)),  # b1     (resident)
            pl.BlockSpec((256, 128),         lambda i: (0, 0)),  # w2     (resident)
            pl.BlockSpec((1, 128),           lambda i: (0, 0)),  # b2     (resident)
            pl.BlockSpec((128, 2),           lambda i: (0, 0)),  # w3a    (resident)
            pl.BlockSpec((3, 2),             lambda i: (0, 0)),  # w3b    (resident)
            pl.BlockSpec((1, 2),             lambda i: (0, 0)),  # b3     (resident)
        ],
        out_specs=pl.BlockSpec((tile_b, 2), lambda i: (i, 0)),
        compiler_params=pltpu.CompilerParams(
            dimension_semantics=("parallel",),
            vmem_limit_bytes=vmem_limit,
        ),
        cost_estimate=cost,
    )(feat, finfo, w1, b1_2d, w2, b2_2d, w3a, w3b, b3_2d)

    return out[:B] if B_pad != B else out


def init_params(feat_dim=512, seed=0):
    """Deterministic synthetic parameters matching FDecoder's shapes ((in, out) layout)."""
    key = jax.random.PRNGKey(seed)
    k1, k2, k3, k4, k5, k6 = jax.random.split(key, 6)
    w1 = jax.random.normal(k1, (feat_dim, 256), jnp.float32) * (1.0 / jnp.sqrt(feat_dim))
    b1 = jax.random.normal(k2, (256,), jnp.float32) * 0.01
    w2 = jax.random.normal(k3, (256, 128), jnp.float32) * (1.0 / jnp.sqrt(256.0))
    b2 = jax.random.normal(k4, (128,), jnp.float32) * 0.01
    w3 = jax.random.normal(k5, (128 + 3, 2), jnp.float32) * (1.0 / jnp.sqrt(131.0))
    b3 = jax.random.normal(k6, (2,), jnp.float32) * 0.01
    return dict(w1=w1, b1=b1, w2=w2, b2=b2, w3=w3, b3=b3)


def reference_forward(feat, finfo, params):
    """Pure-JAX reference mirroring the PyTorch forward exactly."""
    h = jnp.maximum(feat @ params["w1"] + params["b1"], 0.0)
    h = jnp.maximum(h @ params["w2"] + params["b2"], 0.0)
    cat = jnp.concatenate([h, finfo], axis=1)
    return cat @ params["w3"] + params["b3"]


if __name__ == "__main__":
    FEAT_DIM = 512  # module default

    key = jax.random.PRNGKey(0)
    kf, ki = jax.random.split(key)
    params = init_params(FEAT_DIM, seed=0)

    # Ragged batch exercises the grid + padding path (B=20 pads to 24, grid of 3 tiles).
    B = 20
    feat = jax.random.normal(kf, (B, FEAT_DIM), jnp.float32)
    finfo = jax.random.normal(ki, (B, 3), jnp.float32)
    ref = reference_forward(feat, finfo, params)

    # f32 path: exact (tight tolerance).
    out = jax.block_until_ready(fdecoder_forward(feat, finfo, params, tile_b=8))
    assert out.shape == (B, 2)
    assert jnp.allclose(out, ref, atol=1e-4, rtol=1e-4), "f32 mismatch vs reference"

    # bf16-weight path (f32 accumulate): relaxed tolerance.
    out_bf16 = jax.block_until_ready(
        fdecoder_forward(feat, finfo, params, tile_b=8, use_bf16=True))
    assert out_bf16.shape == (B, 2)
    assert jnp.allclose(out_bf16, ref, atol=1e-1, rtol=1e-1), "bf16 mismatch vs reference"

    print("KERNEL_OK")
</pallas_src>

<mosaic_0001>
module attributes {stable_mosaic.version = 11 : i64} {
  func.func @fdecoder_kernel(%arg0: i32, %arg1: memref<8x512xf32, #tpu.memory_space<vmem>>, %arg2: memref<8x3xf32, #tpu.memory_space<vmem>>, %arg3: memref<512x256xf32, #tpu.memory_space<vmem>>, %arg4: memref<1x256xf32, #tpu.memory_space<vmem>>, %arg5: memref<256x128xf32, #tpu.memory_space<vmem>>, %arg6: memref<1x128xf32, #tpu.memory_space<vmem>>, %arg7: memref<128x2xf32, #tpu.memory_space<vmem>>, %arg8: memref<3x2xf32, #tpu.memory_space<vmem>>, %arg9: memref<1x2xf32, #tpu.memory_space<vmem>>, %arg10: memref<8x2xf32, #tpu.memory_space<vmem>>) attributes {dimension_semantics = [#tpu.dimension_semantics<parallel>], iteration_bounds = array<i64: 3>, scalar_prefetch = 0 : i64, scratch_operands = 0 : i64, tpu.core_type = #tpu.core_type<tc>, window_params = [{transform_indices = @transform_0, window_bounds = array<i64: 8, 512>}, {transform_indices = @transform_1, window_bounds = array<i64: 8, 3>}, {pipeline_mode = #tpu.pipeline_mode<synchronous>, transform_indices = @transform_2, window_bounds = array<i64: 512, 256>}, {pipeline_mode = #tpu.pipeline_mode<synchronous>, transform_indices = @transform_3, window_bounds = array<i64: 1, 256>}, {pipeline_mode = #tpu.pipeline_mode<synchronous>, transform_indices = @transform_4, window_bounds = array<i64: 256, 128>}, {pipeline_mode = #tpu.pipeline_mode<synchronous>, transform_indices = @transform_5, window_bounds = array<i64: 1, 128>}, {pipeline_mode = #tpu.pipeline_mode<synchronous>, transform_indices = @transform_6, window_bounds = array<i64: 128, 2>}, {pipeline_mode = #tpu.pipeline_mode<synchronous>, transform_indices = @transform_7, window_bounds = array<i64: 3, 2>}, {pipeline_mode = #tpu.pipeline_mode<synchronous>, transform_indices = @transform_8, window_bounds = array<i64: 1, 2>}, {transform_indices = @transform_9, window_bounds = array<i64: 8, 2>}]} {
    %c0 = arith.constant 0 : index
    %c0_0 = arith.constant 0 : index
    %0 = vector.load %arg1[%c0, %c0_0] : memref<8x512xf32, #tpu.memory_space<vmem>>, vector<8x512xf32>
    %c0_1 = arith.constant 0 : index
    %c0_2 = arith.constant 0 : index
    %1 = vector.load %arg3[%c0_1, %c0_2] : memref<512x256xf32, #tpu.memory_space<vmem>>, vector<512x256xf32>
    %cst = arith.constant dense<0.000000e+00> : vector<8x256xf32>
    %2 = tpu.matmul %0, %1, %cst {dimension_numbers = #tpu.dot_dimension_numbers<[1], [0], [0], [1], [0, 0, 1, 1], [], []>} : vector<8x512xf32>, vector<512x256xf32>, vector<8x256xf32> -> vector<8x256xf32>
    %c0_3 = arith.constant 0 : index
    %c0_4 = arith.constant 0 : index
    %3 = vector.load %arg4[%c0_3, %c0_4] : memref<1x256xf32, #tpu.memory_space<vmem>>, vector<1x256xf32>
    %4 = vector.broadcast %3 : vector<1x256xf32> to vector<8x256xf32>
    %5 = arith.addf %2, %4 : vector<8x256xf32>
    %cst_5 = arith.constant 0.000000e+00 : f32
    %6 = vector.broadcast %cst_5 : f32 to vector<8x256xf32>
    %7 = arith.maximumf %5, %6 : vector<8x256xf32>
    %c0_6 = arith.constant 0 : index
    %c0_7 = arith.constant 0 : index
    %8 = vector.load %arg5[%c0_6, %c0_7] : memref<256x128xf32, #tpu.memory_space<vmem>>, vector<256x128xf32>
    %cst_8 = arith.constant dense<0.000000e+00> : vector<8x128xf32>
    %9 = tpu.matmul %7, %8, %cst_8 {dimension_numbers = #tpu.dot_dimension_numbers<[1], [0], [0], [1], [0, 0, 1, 1], [], []>} : vector<8x256xf32>, vector<256x128xf32>, vector<8x128xf32> -> vector<8x128xf32>
    %c0_9 = arith.constant 0 : index
    %c0_10 = arith.constant 0 : index
    %10 = vector.load %arg6[%c0_9, %c0_10] : memref<1x128xf32, #tpu.memory_space<vmem>>, vector<1x128xf32>
    %11 = vector.broadcast %10 : vector<1x128xf32> to vector<8x128xf32>
    %12 = arith.addf %9, %11 : vector<8x128xf32>
    %cst_11 = arith.constant 0.000000e+00 : f32
    %13 = vector.broadcast %cst_11 : f32 to vector<8x128xf32>
    %14 = arith.maximumf %12, %13 : vector<8x128xf32>
    %c0_12 = arith.constant 0 : index
    %c0_13 = arith.constant 0 : index
    %15 = vector.load %arg7[%c0_12, %c0_13] : memref<128x2xf32, #tpu.memory_space<vmem>>, vector<128x2xf32>
    %cst_14 = arith.constant dense<0.000000e+00> : vector<8x2xf32>
    %16 = tpu.matmul %14, %15, %cst_14 {dimension_numbers = #tpu.dot_dimension_numbers<[1], [0], [0], [1], [0, 0, 1, 1], [], []>} : vector<8x128xf32>, vector<128x2xf32>, vector<8x2xf32> -> vector<8x2xf32>
    %c0_15 = arith.constant 0 : index
    %c0_16 = arith.constant 0 : index
    %17 = vector.load %arg9[%c0_15, %c0_16] : memref<1x2xf32, #tpu.memory_space<vmem>>, vector<1x2xf32>
    %18 = vector.broadcast %17 : vector<1x2xf32> to vector<8x2xf32>
    %19 = arith.addf %16, %18 : vector<8x2xf32>
    %c0_17 = arith.constant 0 : index
    %c0_18 = arith.constant 0 : index
    %20 = vector.load %arg2[%c0_17, %c0_18] : memref<8x3xf32, #tpu.memory_space<vmem>>, vector<8x3xf32>
    %c0_19 = arith.constant 0 : index
    %c0_20 = arith.constant 0 : index
    %21 = vector.load %arg8[%c0_19, %c0_20] : memref<3x2xf32, #tpu.memory_space<vmem>>, vector<3x2xf32>
    %22 = vector.extract_strided_slice %20 {offsets = [0, 0], sizes = [8, 1], strides = [1, 1]} : vector<8x3xf32> to vector<8x1xf32>
    %23 = vector.extract_strided_slice %21 {offsets = [0, 0], sizes = [1, 2], strides = [1, 1]} : vector<3x2xf32> to vector<1x2xf32>
    %24 = vector.broadcast %22 : vector<8x1xf32> to vector<8x2xf32>
    %25 = vector.broadcast %23 : vector<1x2xf32> to vector<8x2xf32>
    %26 = arith.mulf %24, %25 : vector<8x2xf32>
    %27 = arith.addf %19, %26 : vector<8x2xf32>
    %28 = vector.extract_strided_slice %20 {offsets = [0, 1], sizes = [8, 1], strides = [1, 1]} : vector<8x3xf32> to vector<8x1xf32>
    %29 = vector.extract_strided_slice %21 {offsets = [1, 0], sizes = [1, 2], strides = [1, 1]} : vector<3x2xf32> to vector<1x2xf32>
    %30 = vector.broadcast %28 : vector<8x1xf32> to vector<8x2xf32>
    %31 = vector.broadcast %29 : vector<1x2xf32> to vector<8x2xf32>
    %32 = arith.mulf %30, %31 : vector<8x2xf32>
    %33 = arith.addf %27, %32 : vector<8x2xf32>
    %34 = vector.extract_strided_slice %20 {offsets = [0, 2], sizes = [8, 1], strides = [1, 1]} : vector<8x3xf32> to vector<8x1xf32>
    %35 = vector.extract_strided_slice %21 {offsets = [2, 0], sizes = [1, 2], strides = [1, 1]} : vector<3x2xf32> to vector<1x2xf32>
    %36 = vector.broadcast %34 : vector<8x1xf32> to vector<8x2xf32>
    %37 = vector.broadcast %35 : vector<1x2xf32> to vector<8x2xf32>
    %38 = arith.mulf %36, %37 : vector<8x2xf32>
    %39 = arith.addf %33, %38 : vector<8x2xf32>
    %c0_21 = arith.constant 0 : index
    %c0_22 = arith.constant 0 : index
    %40 = vector.load %arg10[%c0_21, %c0_22] : memref<8x2xf32, #tpu.memory_space<vmem>>, vector<8x2xf32>
    tpu.vector_store %arg10[%c0_21, %c0_22], %39 {strides = array<i32>} : memref<8x2xf32, #tpu.memory_space<vmem>>, vector<8x2xf32>,
    return
  }
  func.func @transform_0(%arg0: i32) -> (i32, i32) {
    %c0_i32 = arith.constant 0 : i32
    %c0_i32_0 = arith.constant 0 : i32
    return %arg0, %c0_i32 : i32, i32
  }
  func.func @transform_1(%arg0: i32) -> (i32, i32) {
    %c0_i32 = arith.constant 0 : i32
    %c0_i32_0 = arith.constant 0 : i32
    return %arg0, %c0_i32 : i32, i32
  }
  func.func @transform_2(%arg0: i32) -> (i32, i32) {
    %c0_i32 = arith.constant 0 : i32
    %c0_i32_0 = arith.constant 0 : i32
    %c0_i32_1 = arith.constant 0 : i32
    return %c0_i32, %c0_i32_0 : i32, i32
  }
  func.func @transform_3(%arg0: i32) -> (i32, i32) {
    %c0_i32 = arith.constant 0 : i32
    %c0_i32_0 = arith.constant 0 : i32
    %c0_i32_1 = arith.constant 0 : i32
    return %c0_i32, %c0_i32_0 : i32, i32
  }
  func.func @transform_4(%arg0: i32) -> (i32, i32) {
    %c0_i32 = arith.constant 0 : i32
    %c0_i32_0 = arith.constant 0 : i32
    %c0_i32_1 = arith.constant 0 : i32
    return %c0_i32, %c0_i32_0 : i32, i32
  }
  func.func @transform_5(%arg0: i32) -> (i32, i32) {
    %c0_i32 = arith.constant 0 : i32
    %c0_i32_0 = arith.constant 0 : i32
    %c0_i32_1 = arith.constant 0 : i32
    return %c0_i32, %c0_i32_0 : i32, i32
  }
  func.func @transform_6(%arg0: i32) -> (i32, i32) {
    %c0_i32 = arith.constant 0 : i32
    %c0_i32_0 = arith.constant 0 : i32
    %c0_i32_1 = arith.constant 0 : i32
    return %c0_i32, %c0_i32_0 : i32, i32
  }
  func.func @transform_7(%arg0: i32) -> (i32, i32) {
    %c0_i32 = arith.constant 0 : i32
    %c0_i32_0 = arith.constant 0 : i32
    %c0_i32_1 = arith.constant 0 : i32
    return %c0_i32, %c0_i32_0 : i32, i32
  }
  func.func @transform_8(%arg0: i32) -> (i32, i32) {
    %c0_i32 = arith.constant 0 : i32
    %c0_i32_0 = arith.constant 0 : i32
    %c0_i32_1 = arith.constant 0 : i32
    return %c0_i32, %c0_i32_0 : i32, i32
  }
  func.func @transform_9(%arg0: i32) -> (i32, i32) {
    %c0_i32 = arith.constant 0 : i32
    %c0_i32_0 = arith.constant 0 : i32
    return %arg0, %c0_i32 : i32, i32
  }
}

</mosaic_0001>

<bundles_post_ra>
// kernel: tpu_custom_call.1
= control target key start
LH: loop header
LB: loop body
LE: loop exit
PB: predicated region body
PF: predicated region fallthrough
CT: control target
= control target key end

     0   :  { %14 = vsyncpa [#allocation3], 0  ;;  %s1644_s0 = inlined_call_operand.vmem [shape: f32[24,512], index: 0, kind: input, shape index: {}]   ;;  %s1645_s1 = inlined_call_operand.vmem [shape: f32[24,3], index: 1, kind: input, shape index: {}]   ;;  %s1646_s2 = inlined_call_operand.hbm [shape: f32[512,256], index: 2, kind: input, shape index: {}]   ;;  %s1647_s3 = inlined_call_operand.vmem [shape: f32[1,256], index: 3, kind: input, shape index: {}]   ;;  %s1648_s4 = inlined_call_operand.hbm [shape: f32[256,128], index: 4, kind: input, shape index: {}]   ;;  %s1649_s5 = inlined_call_operand.vmem [shape: f32[1,128], index: 5, kind: input, shape index: {}]   ;;  %s1650_s6 = inlined_call_operand.vmem [shape: f32[128,2], index: 6, kind: input, shape index: {}]   ;;  %s1651_s7 = inlined_call_operand.vmem [shape: f32[3,2], index: 7, kind: input, shape index: {}]   ;;  %s1652_s8 = inlined_call_operand.vmem [shape: f32[1,2], index: 8, kind: input, shape index: {}]   ;;  %s1653_s9 = inlined_call_operand.vmem [shape: f32[24,2], index: 9, kind: output, shape index: {}]  }
   0x1   :  { %15 = vsyncpa [#allocation5], 0  ;;  %s1461_s30 = smov 0  }
   0x2 LB: > { %s1399_s10 = smov [#allocation2]   ;;  %s1467_s12 = sadd.s32 4294967295, %s1397_s30   ;;  %s1397_s30 = sphi %s1461_s30, %s21_s30  }
   0x3   : > { %s263_s11 = sshll.u32 %s1399_s10, 4  ;;  %p993_p0 = scmp.ge.s32.totalorder %s1397_s30, 1  ;;  %s264_s11 = int_to_ptr.vmem [resolvable:$true] %s263_s11 }
   0x4   : > { %p251_p1 = scmp.lt.s32.totalorder %s1397_s30, 4  ;;  %p1654_p3 = scmp.eq.s32.totalorder %s1467_s12, 0 }
   0x5   : > { %s1400_s14 = smov [#allocation4]   ;;  %s1327_s19 = scalar_lea.hbm %s1646_s2, 16384 }
   0x6   : > { %p1471_p2 = pnand %p993_p0, %p251_p1  ;;  %s279_s15 = sshll.u32 %s1400_s14, 4  ;;  %s1484_s15 = int_to_ptr.vmem [resolvable:$true] %s279_s15 }
   0x7   : > { %p1328_p6 = scmp.ne.s32.totalorder %s1646_s2, %s1327_s19  ;;  %p1334_p10 = scmp.lt.u32.totalorder %s1327_s19, %s1646_s2 }
   0x8   : > { %s1656_s13 = scalar_select %p1471_p2, 1, 0 }
   0x9   : > { %p1292_p4 = pneg %p1471_p2 }
   0xb   : > { %p1480_p5 = pnand %p1654_p3, %p1292_p4 }
   0xd   : > { %p1329_p7 = pneg %p1480_p5 }
   0xf   : > { %p1330_p8 = pnand %p1329_p7, %p1328_p6 }
  0x11   : > { %p1331_p9 = pneg %p1330_p8 }
  0x13   : > { %p1336_p11 = pnand %p1334_p10, %p1331_p9 }
  0x15   : > { %1339 = shalt.err (!%p1336_p11)
}
  0x16   : > { %s1340_s24 = scalar_lea.vmem %s264_s11, 16384  ;;  %p1348_p1 = scmp.lt.s32.totalorder %s264_s11, %s264_s11 }
  0x17   : > { %p1341_p12 = scmp.ne.s32.totalorder %s264_s11, %s1340_s24  ;;  %p1349_p4 = scmp.lt.s32.totalorder %s1340_s24, %s1340_s24 }
  0x19   : > { %p1343_p13 = pnand %p1341_p12, %p1329_p7  ;;  %p1350_p3 = por %p1349_p4, %p1348_p1 }
  0x1b   : > { %p1344_p0 = pneg %p1343_p13 }
  0x1d   : > { %p1351_p2 = pnand %p1350_p3, %p1344_p0 }
  0x1f   : > { %1354 = shalt.err (!%p1351_p2)
}
  0x20   : > { %s1401_s25 = smov 256   ;;  %s1402_s26 = smov 16  }
  0x21   : > { %1295 = dma.hbm_to_vmem [thread:$0]  (!%p1480_p5), %s1646_s2, 16384, %s264_s11, [#allocation3], %s1401_s25, %s1401_s25, %s1402_s26  }
  0x22   : > { %s1355_s14 = scalar_lea.hbm %s1648_s4, 4096 }
  0x23   : > { %p1356_p6 = scmp.ne.s32.totalorder %s1648_s4, %s1355_s14  ;;  %p1362_p8 = scmp.lt.u32.totalorder %s1355_s14, %s1648_s4 }
  0x25   : > { %p1358_p2 = pnand %p1356_p6, %p1329_p7 }
  0x27   : > { %p1359_p3 = pneg %p1358_p2 }
  0x29   : > { %p1364_p9 = pnand %p1362_p8, %p1359_p3 }
  0x2b   : > { %1367 = shalt.err (!%p1364_p9)
}
  0x2c   : > { %s1368_s11 = scalar_lea.vmem %s1484_s15, 4096  ;;  %p1376_p13 = scmp.lt.s32.totalorder %s1484_s15, %s1484_s15 }
  0x2d   : > { %p1369_p10 = scmp.ne.s32.totalorder %s1484_s15, %s1368_s11  ;;  %p1377_p0 = scmp.lt.s32.totalorder %s1368_s11, %s1368_s11 }
  0x2f   : > { %p1371_p11 = pnand %p1369_p10, %p1329_p7  ;;  %p1378_p1 = por %p1377_p0, %p1376_p13 }
  0x31   : > { %p1372_p12 = pneg %p1371_p11 }
  0x33   : > { %p1379_p4 = pnand %p1378_p1, %p1372_p12 }
  0x35   : > { %1382 = shalt.err (!%p1379_p4)
}
  0x36   : > { %s1403_s21 = smov 128   ;;  %s1404_s22 = smov 8  }
  0x37   : > { %1298 = dma.hbm_to_vmem [thread:$0]  (!%p1480_p5), %s1648_s4, 4096, %s1484_s15, [#allocation5], %s1403_s21, %s1403_s21, %s1404_s22  }
  0x38   : > { %p1658_p6 = scmp.ne.s32.totalorder %s1656_s13, 0 }
  0x39   : > { %p1659_p7 = scmp.eq.s32.totalorder (!%p1658_p6), %s1467_s12, 0 }
  0x3a   : > { %322 = sbr.rel (%p1658_p6) target bundleno = 859 (0x35b), region = 56 }
  0x41   : > { %1388 = dma.done.wait (%p1659_p7), [#allocation3], 16384   ;;  %p1660_p2 = pmov %p1659_p7 }
  0x43   : > { %1390 = vsyncadd (%p1660_p2), [#allocation3], 4294950912  ;;  %p1661_p3 = pmov %p1660_p2 }
  0x44   : > { %p1662_p8 = pmov %p1660_p2 }
  0x45   : > { %1392 = dma.done.wait (%p1661_p3), [#allocation5], 4096  }
  0x46   : > { %1394 = vsyncadd (%p1662_p8), [#allocation5], 4294963200  ;;  %v383_v0 = vld [vmem:[#allocation2 + $0x8] sm:$0xff]  ;;  %v385_v1 = vld [vmem:[#allocation2 + $0x18] sm:$0xff]  ;;  %p365_p5 = scmp.lt.s32.totalorder %s1467_s12, 2  ;;  %vm1406_vm0 = vmmov 0  }
  0x47   : > { %v382_v2 = vld [vmem:[#allocation2] sm:$0xff]  ;;  %v1096_v3 = vpack.c.bf16 %v385_v1, %v383_v0  ;;  %v384_v4 = vld [vmem:[#allocation2 + $0x10] sm:$0xff]  ;;  %v387_v5 = vld [vmem:[#allocation2 + $0x28] sm:$0xff]  ;;  %vm902_vm1 = vcmask 15360  }
  0x48   : > { %v389_v6 = vld [vmem:[#allocation2 + $0x38] sm:$0xff]  ;;  %v1098_v7 = vpack.c.bf16 %v384_v4, %v382_v2  ;;  %v386_v9 = vld [vmem:[#allocation2 + $0x20] sm:$0xff]  ;;  %v388_v10 = vld [vmem:[#allocation2 + $0x30] sm:$0xff]  ;;  %s1664_s12 = smov (!%p365_p5, %s1467_s12), 2 }
  0x49   : > { %v1100_v8 = vpack.c.bf16 %v389_v6, %v387_v5  ;;  %v391_v11 = vld [vmem:[#allocation2 + $0x48] sm:$0xff]  ;;  %1097 = vmatprep.subr.bf16.mxu0 %v1096_v3  ;;  %v393_v12 = vld [vmem:[#allocation2 + $0x58] sm:$0xff]  ;;  %v1102_v13 = vpack.c.bf16 %v388_v10, %v386_v9  ;;  %v390_v15 = vld [vmem:[#allocation2 + $0x40] sm:$0xff]  ;;  %s1008_s13 = sshll.u32 %s1664_s12, 5 }
  0x4a   : > { %1099 = vmatpush1.bf16.msra.mxu0 %v1098_v7  ;;  %v1104_v14 = vpack.c.bf16 %v393_v12, %v391_v11  ;;  %v392_v16 = vld [vmem:[#allocation2 + $0x50] sm:$0xff]  ;;  %v395_v17 = vld [vmem:[#allocation2 + $0x68] sm:$0xff]  ;;  %v397_v18 = vld [vmem:[#allocation2 + $0x78] sm:$0xff]  ;;  %s1551_s25 = scalar_lea.vmem %s1644_s0, %s1008_s13  ;;  %s1002_s13 = sshll.u32 %s1664_s12, 3 }
  0x4b   : > { %1101 = vmatprep.subr.bf16.mxu0 %v1100_v8  ;;  %v1106_v19 = vpack.c.bf16 %v392_v16, %v390_v15  ;;  %v1108_v20 = vpack.c.bf16 %v397_v18, %v395_v17  ;;  %v394_v21 = vld [vmem:[#allocation2 + $0x60] sm:$0xff]  ;;  %v396_v22 = vld [vmem:[#allocation2 + $0x70] sm:$0xff]  ;;  %v399_v23 = vld [vmem:[#allocation2 + $0x88] sm:$0xff]  ;;  %s377_s19 = scalar_lea.vmem %s1653_s9, %s1002_s13 }
  0x4c   : > { %v401_v24 = vld [vmem:[#allocation2 + $0x98] sm:$0xff]  ;;  %v1110_v25 = vpack.c.bf16 %v396_v22, %v394_v21  ;;  %v398_v27 = vld [vmem:[#allocation2 + $0x80] sm:$0xff]  ;;  %v400_v28 = vld [vmem:[#allocation2 + $0x90] sm:$0xff] }
  0x4d   : > { %v1112_v26 = vpack.c.bf16 %v401_v24, %v399_v23  ;;  %v403_v29 = vld [vmem:[#allocation2 + $0xa8] sm:$0xff]  ;;  %v405_v30 = vld [vmem:[#allocation2 + $0xb8] sm:$0xff]  ;;  %v1114_v31 = vpack.c.bf16 %v400_v28, %v398_v27  ;;  %v402_v33 = vld [vmem:[#allocation2 + $0xa0] sm:$0xff] }
  0x4e   : > { %1103 = vmatpush1.bf16.msra.mxu0 %v1102_v13  ;;  %v1116_v32 = vpack.c.bf16 %v405_v30, %v403_v29  ;;  %v404_v34 = vld [vmem:[#allocation2 + $0xb0] sm:$0xff]  ;;  %v407_v35 = vld [vmem:[#allocation2 + $0xc8] sm:$0xff]  ;;  %v409_v36 = vld [vmem:[#allocation2 + $0xd8] sm:$0xff] }
  0x4f   : > { %1105 = vmatprep.subr.bf16.mxu0 %v1104_v14  ;;  %v1118_v37 = vpack.c.bf16 %v404_v34, %v402_v33  ;;  %v1120_v38 = vpack.c.bf16 %v409_v36, %v407_v35  ;;  %v406_v39 = vld [vmem:[#allocation2 + $0xc0] sm:$0xff]  ;;  %v408_v40 = vld [vmem:[#allocation2 + $0xd0] sm:$0xff]  ;;  %v379_v41 = vld [vmem:[%s1551_s25 + $0x8] sm:$0xff] }
  0x50   : > { %v411_v42 = vld [vmem:[#allocation2 + $0xe8] sm:$0xff]  ;;  %v413_v43 = vld [vmem:[#allocation2 + $0xf8] sm:$0xff]  ;;  %586 = vmatprep.mubr.f32.mxu0 %v379_v41  ;;  %v1122_v44 = vpack.c.bf16 %v408_v40, %v406_v39  ;;  %v410_v46 = vld [vmem:[#allocation2 + $0xe0] sm:$0xff] }
  0x51   : > { %v1124_v45 = vpack.c.bf16 %v413_v43, %v411_v42  ;;  %v412_v47 = vld [vmem:[#allocation2 + $0xf0] sm:$0xff]  ;;  %v415_v48 = vld [vmem:[#allocation2 + $0x108] sm:$0xff]  ;;  %v417_v49 = vld [vmem:[#allocation2 + $0x118] sm:$0xff] }
  0x52   : > { %1107 = vmatpush1.bf16.msra.mxu0 %v1106_v19  ;;  %v1126_v50 = vpack.c.bf16 %v412_v47, %v410_v46  ;;  %v1128_v51 = vpack.c.bf16 %v417_v49, %v415_v48  ;;  %v414_v52 = vld [vmem:[#allocation2 + $0x100] sm:$0xff]  ;;  %v416_v53 = vld [vmem:[#allocation2 + $0x110] sm:$0xff]  ;;  %v419_v54 = vld [vmem:[#allocation2 + $0x128] sm:$0xff] }
  0x53   : > { %1109 = vmatprep.subr.bf16.mxu0 %v1108_v20  ;;  %v421_v55 = vld [vmem:[#allocation2 + $0x138] sm:$0xff]  ;;  %v1130_v56 = vpack.c.bf16 %v416_v53, %v414_v52  ;;  %v418_v58 = vld [vmem:[#allocation2 + $0x120] sm:$0xff]  ;;  %v420_v59 = vld [vmem:[#allocation2 + $0x130] sm:$0xff] }
  0x54   : > { %v1132_v57 = vpack.c.bf16 %v421_v55, %v419_v54  ;;  %v423_v60 = vld [vmem:[#allocation2 + $0x148] sm:$0xff]  ;;  %v425_v61 = vld [vmem:[#allocation2 + $0x158] sm:$0xff]  ;;  %v1134_v62 = vpack.c.bf16 %v420_v59, %v418_v58  ;;  %v422_v0 = vld [vmem:[#allocation2 + $0x140] sm:$0xff] }
  0x55   : > { %v1136_v63 = vpack.c.bf16 %v425_v61, %v423_v60  ;;  %v424_v1 = vld [vmem:[#allocation2 + $0x150] sm:$0xff]  ;;  %v427_v2 = vld [vmem:[#allocation2 + $0x168] sm:$0xff]  ;;  %v429_v3 = vld [vmem:[#allocation2 + $0x178] sm:$0xff] }
  0x56   : > { %1111 = vmatpush1.bf16.msra.mxu0 %v1110_v25  ;;  %v1138_v4 = vpack.c.bf16 %v424_v1, %v422_v0  ;;  %v1140_v5 = vpack.c.bf16 %v429_v3, %v427_v2  ;;  %v426_v6 = vld [vmem:[#allocation2 + $0x160] sm:$0xff]  ;;  %v428_v7 = vld [vmem:[#allocation2 + $0x170] sm:$0xff]  ;;  %v431_v8 = vld [vmem:[#allocation2 + $0x188] sm:$0xff] }
  0x57   : > { %1113 = vmatprep.subr.bf16.mxu0 %v1112_v26  ;;  %v433_v9 = vld [vmem:[#allocation2 + $0x198] sm:$0xff]  ;;  %v430_v10 = vld [vmem:[#allocation2 + $0x180] sm:$0xff]  ;;  %v432_v11 = vld [vmem:[#allocation2 + $0x190] sm:$0xff]  ;;  %v1142_v12 = vpack.c.bf16 %v428_v7, %v426_v6 }
  0x58   : > { %v435_v13 = vld [vmem:[#allocation2 + $0x1a8] sm:$0xff]  ;;  %v437_v14 = vld [vmem:[#allocation2 + $0x1b8] sm:$0xff]  ;;  %v682_v15 = vld [vmem:[#allocation4 + $0x80] sm:$0xff]  ;;  %v1144_v18 = vpack.c.bf16 %v433_v9, %v431_v8  ;;  %v1146_v29 = vpack.c.bf16 %v432_v11, %v430_v10 }
  0x59   : > { %v683_v16 = vld [vmem:[#allocation4 + $0x88] sm:$0xff]  ;;  %v666_v17 = vld [vmem:[#allocation4] sm:$0xff]  ;;  %v684_v21 = vld [vmem:[#allocation4 + $0x90] sm:$0xff]  ;;  %v1148_v33 = vpack.c.bf16 %v437_v14, %v435_v13 }
  0x5a   : > { %1115 = vmatpush1.bf16.msra.mxu0 %v1114_v31  ;;  %v1224_v19 = vpack.c.bf16 %v683_v16, %v682_v15  ;;  %v667_v20 = vld [vmem:[#allocation4 + $0x8] sm:$0xff]  ;;  %v685_v22 = vld [vmem:[#allocation4 + $0x98] sm:$0xff]  ;;  %v668_v25 = vld [vmem:[#allocation4 + $0x10] sm:$0xff] }
  0x5b   : > { %1117 = vmatprep.subr.bf16.mxu0 %v1116_v32  ;;  %v1226_v23 = vpack.c.bf16 %v667_v20, %v666_v17  ;;  %v1228_v24 = vpack.c.bf16 %v685_v22, %v684_v21  ;;  %v669_v26 = vld [vmem:[#allocation4 + $0x18] sm:$0xff]  ;;  %v686_v27 = vld [vmem:[#allocation4 + $0xa0] sm:$0xff]  ;;  %v687_v28 = vld [vmem:[#allocation4 + $0xa8] sm:$0xff] }
  0x5c   : > { %1225 = vmatprep.subr.bf16.mxu1 %v1224_v19  ;;  %v434_v30 = vld [vmem:[#allocation2 + $0x1a0] sm:$0xff]  ;;  %v436_v31 = vld [vmem:[#allocation2 + $0x1b0] sm:$0xff]  ;;  %v1230_v32 = vpack.c.bf16 %v669_v26, %v668_v25  ;;  %v439_v34 = vld [vmem:[#allocation2 + $0x1c8] sm:$0xff]  ;;  %v1232_v35 = vpack.c.bf16 %v687_v28, %v686_v27 }
  0x5d   : > { %1227 = vmatpush3.bf16.msra.mxu1 %v1226_v23  ;;  %v670_v36 = vld [vmem:[#allocation4 + $0x20] sm:$0xff]  ;;  %v688_v39 = vld [vmem:[#allocation4 + $0xb0] sm:$0xff]  ;;  %v689_v40 = vld [vmem:[#allocation4 + $0xb8] sm:$0xff]  ;;  %v1150_v41 = vpack.c.bf16 %v436_v31, %v434_v30 }
  0x5e   : > { %1119 = vmatpush1.bf16.msra.mxu0 %v1118_v37  ;;  %1229 = vmatprep.subr.bf16.mxu1 %v1228_v24  ;;  %v671_v37 = vld [vmem:[#allocation4 + $0x28] sm:$0xff]  ;;  %v438_v42 = vld [vmem:[#allocation2 + $0x1c0] sm:$0xff]  ;;  %v440_v43 = vld [vmem:[#allocation2 + $0x1d0] sm:$0xff]  ;;  %v1236_v47 = vpack.c.bf16 %v689_v40, %v688_v39 }
  0x5f   : > { %1121 = vmatprep.subr.bf16.mxu0 %v1120_v38  ;;  %v441_v38 = vld [vmem:[#allocation2 + $0x1d8] sm:$0xff]  ;;  %v443_v46 = vld [vmem:[#allocation2 + $0x1e8] sm:$0xff]  ;;  %v672_v48 = vld [vmem:[#allocation4 + $0x30] sm:$0xff]  ;;  %v1154_v53 = vpack.c.bf16 %v440_v43, %v438_v42 }
  0x60   : > { %v673_v49 = vld [vmem:[#allocation4 + $0x38] sm:$0xff]  ;;  %v691_v52 = vld [vmem:[#allocation4 + $0xc8] sm:$0xff]  ;;  %v442_v54 = vld [vmem:[#allocation2 + $0x1e0] sm:$0xff] }
  0x61   : > { %1231 = vmatpush3.bf16.msra.mxu1 %v1230_v32  ;;  %v444_v55 = vld [vmem:[#allocation2 + $0x1f0] sm:$0xff]  ;;  %v447_v58 = vld [vmem:[#allocation2 + $0x208] sm:$0xff]  ;;  %v674_v60 = vld [vmem:[#allocation4 + $0x40] sm:$0xff] }
  0x62   : > { %1123 = vmatpush1.bf16.msra.mxu0 %v1122_v44  ;;  %v1234_v44 = vpack.c.bf16 %v671_v37, %v670_v36  ;;  %1233 = vmatprep.subr.bf16.mxu1 %v1232_v35  ;;  %v675_v61 = vld [vmem:[#allocation4 + $0x48] sm:$0xff]  ;;  %v693_v0 = vld [vmem:[#allocation4 + $0xd8] sm:$0xff]  ;;  %v1158_v1 = vpack.c.bf16 %v444_v55, %v442_v54  ;;  %v676_v9 = vld [vmem:[#allocation4 + $0x50] sm:$0xff] }
  0x63   : > { %1125 = vmatprep.subr.bf16.mxu0 %v1124_v45  ;;  %v1152_v45 = vpack.c.bf16 %v441_v38, %v439_v34  ;;  %v1242_v2 = vpack.c.bf16 %v675_v61, %v674_v60  ;;  %v451_v6 = vld [vmem:[#allocation2 + $0x228] sm:$0xff]  ;;  %v453_v8 = vld [vmem:[#allocation2 + $0x238] sm:$0xff]  ;;  %v694_v11 = vld [vmem:[#allocation4 + $0xe0] sm:$0xff] }
  0x64   : > { %v677_v10 = vld [vmem:[#allocation4 + $0x58] sm:$0xff]  ;;  %v378_v13 = vld [vmem:[%s1551_s25] sm:$0xff]  ;;  %v1164_v15 = vpack.c.bf16 %v453_v8, %v451_v6  ;;  %v452_v17 = vld [vmem:[#allocation2 + $0x230] sm:$0xff] }
  0x65   : > { %1235 = vmatpush3.bf16.msra.mxu1 %v1234_v44  ;;  %v450_v16 = vld [vmem:[#allocation2 + $0x220] sm:$0xff]  ;;  %v1246_v19 = vpack.c.bf16 %v677_v10, %v676_v9  ;;  %v455_v20 = vld [vmem:[#allocation2 + $0x248] sm:$0xff]  ;;  %v457_v21 = vld [vmem:[#allocation2 + $0x258] sm:$0xff] }
  0x66   : > { %1127 = vmatpush1.bf16.msra.mxu0 %v1126_v50  ;;  %v445_v50 = vld [vmem:[#allocation2 + $0x1f8] sm:$0xff]  ;;  %1237 = vmatprep.subr.bf16.mxu1 %v1236_v47  ;;  %v1166_v23 = vpack.c.bf16 %v452_v17, %v450_v16  ;;  %v1168_v24 = vpack.c.bf16 %v457_v21, %v455_v20  ;;  %v454_v25 = vld [vmem:[#allocation2 + $0x240] sm:$0xff]  ;;  %v456_v26 = vld [vmem:[#allocation2 + $0x250] sm:$0xff] }
  0x67   : > { %1129 = vmatprep.subr.bf16.mxu0 %v1128_v51  ;;  %v690_v51 = vld [vmem:[#allocation4 + $0xc0] sm:$0xff]  ;;  %v459_v27 = vld [vmem:[#allocation2 + $0x268] sm:$0xff]  ;;  %v461_v28 = vld [vmem:[#allocation2 + $0x278] sm:$0xff] }
  0x68   : > { %v1240_v59 = vpack.c.bf16 %v691_v52, %v690_v51  ;;  %v1172_v30 = vpack.c.bf16 %v461_v28, %v459_v27  ;;  %v458_v31 = vld [vmem:[#allocation2 + $0x260] sm:$0xff]  ;;  %v460_v32 = vld [vmem:[#allocation2 + $0x270] sm:$0xff]  ;;  %v465_v34 = vld [vmem:[#allocation2 + $0x298] sm:$0xff] }
  0x69   : > { %v1174_v35 = vpack.c.bf16 %v460_v32, %v458_v31  ;;  %v462_v37 = vld [vmem:[#allocation2 + $0x280] sm:$0xff]  ;;  %v464_v38 = vld [vmem:[#allocation2 + $0x290] sm:$0xff]  ;;  %v467_v39 = vld [vmem:[#allocation2 + $0x2a8] sm:$0xff] }
  0x6a   : > { %1131 = vmatpush1.bf16.msra.mxu0 %v1130_v56  ;;  %v1238_v56 = vpack.c.bf16 %v673_v49, %v672_v48  ;;  %v469_v40 = vld [vmem:[#allocation2 + $0x2b8] sm:$0xff]  ;;  %v466_v43 = vld [vmem:[#allocation2 + $0x2a0] sm:$0xff]  ;;  %v468_v44 = vld [vmem:[#allocation2 + $0x2b0] sm:$0xff] }
  0x6b   : > { %1133 = vmatprep.subr.bf16.mxu0 %v1132_v57  ;;  %v1156_v57 = vpack.c.bf16 %v445_v50, %v443_v46  ;;  %v1180_v42 = vpack.c.bf16 %v469_v40, %v467_v39  ;;  %v473_v46 = vld [vmem:[#allocation2 + $0x2d8] sm:$0xff]  ;;  %v1182_v47 = vpack.c.bf16 %v468_v44, %v466_v43  ;;  %v470_v49 = vld [vmem:[#allocation2 + $0x2c0] sm:$0xff]  ;;  %v472_v50 = vld [vmem:[#allocation2 + $0x2d0] sm:$0xff] }
  0x6c   : > { %1239 = vmatpush3.bf16.msra.mxu1 %v1238_v56  ;;  %v475_v51 = vld [vmem:[#allocation2 + $0x2e8] sm:$0xff]  ;;  %v477_v52 = vld [vmem:[#allocation2 + $0x2f8] sm:$0xff]  ;;  %v474_v55 = vld [vmem:[#allocation2 + $0x2e0] sm:$0xff] }
  0x6d   : > { %1241 = vmatprep.subr.bf16.mxu1 %v1240_v59  ;;  %v1188_v54 = vpack.c.bf16 %v477_v52, %v475_v51  ;;  %v476_v56 = vld [vmem:[#allocation2 + $0x2f0] sm:$0xff]  ;;  %v478_v61 = vld [vmem:[#allocation2 + $0x300] sm:$0xff]  ;;  %v489_v6 = vld [vmem:[#allocation2 + $0x358] sm:$0xff]  ;;  %v1405_v52 = vmov 0.0|0.0  }
  0x6e   : > { %1135 = vmatpush1.bf16.msra.mxu0 %v1134_v62  ;;  %v449_v62 = vld [vmem:[#allocation2 + $0x218] sm:$0xff]  ;;  %v1190_v59 = vpack.c.bf16 %v476_v56, %v474_v55  ;;  %v486_v9 = vld [vmem:[#allocation2 + $0x340] sm:$0xff]  ;;  %v488_v10 = vld [vmem:[#allocation2 + $0x350] sm:$0xff] }
  0x6f   : > { %1137 = vmatprep.subr.bf16.mxu0 %v1136_v63  ;;  %v692_v63 = vld [vmem:[#allocation4 + $0xd0] sm:$0xff]  ;;  %v1160_v3 = vpack.c.bf16 %v449_v62, %v447_v58  ;;  %v481_v58 = vld [vmem:[#allocation2 + $0x318] sm:$0xff]  ;;  %v495_v17 = vld [vmem:[#allocation2 + $0x388] sm:$0xff] }
  0x70   : > { %v1244_v7 = vpack.c.bf16 %v693_v0, %v692_v63  ;;  %1243 = vmatpush3.bf16.msra.mxu1 %v1242_v2  ;;  %v480_v62 = vld [vmem:[#allocation2 + $0x310] sm:$0xff]  ;;  %v483_v63 = vld [vmem:[#allocation2 + $0x328] sm:$0xff]  ;;  %v485_v0 = vld [vmem:[#allocation2 + $0x338] sm:$0xff] }
  0x71   : > { %v1196_v2 = vpack.c.bf16 %v485_v0, %v483_v63  ;;  %v492_v16 = vld [vmem:[#allocation2 + $0x370] sm:$0xff]  ;;  %v494_v21 = vld [vmem:[#allocation2 + $0x380] sm:$0xff]  ;;  %v679_v44 = vld [vmem:[#allocation4 + $0x68] sm:$0xff] }
  0x72   : > { %1139 = vmatpush1.bf16.msra.mxu0 %v1138_v4  ;;  %v446_v4 = vld [vmem:[#allocation2 + $0x200] sm:$0xff]  ;;  %1245 = vmatprep.subr.bf16.mxu1 %v1244_v7  ;;  %v500_v28 = vld [vmem:[#allocation2 + $0x3b0] sm:$0xff]  ;;  %v777_v0 = vld [vmem:[%s1650_s6 + $0x8] sm:$0xff] }
  0x73   : > { %1141 = vmatprep.subr.bf16.mxu0 %v1140_v5  ;;  %v448_v5 = vld [vmem:[#allocation2 + $0x210] sm:$0xff]  ;;  %v498_v27 = vld [vmem:[#allocation2 + $0x3a0] sm:$0xff] }
  0x74   : > { %v1162_v14 = vpack.c.bf16 %v448_v5, %v446_v4  ;;  %1247 = vmatpush3.bf16.msra.mxu1 %v1246_v19  ;;  %v484_v4 = vld [vmem:[#allocation2 + $0x330] sm:$0xff]  ;;  %v487_v5 = vld [vmem:[#allocation2 + $0x348] sm:$0xff]  ;;  %v1214_v31 = vpack.c.bf16 %v500_v28, %v498_v27  ;;  %v506_v39 = vld [vmem:[#allocation2 + $0x3e0] sm:$0xff]  ;;  %v1408_v27 = vmov 0   ;;  %v1409_v28 = vmov 2  }
  0x75   : > { %v1200_v8 = vpack.c.bf16 %v489_v6, %v487_v5  ;;  %v508_v40 = vld [vmem:[#allocation2 + $0x3f0] sm:$0xff]  ;;  %v678_v43 = vld [vmem:[#allocation4 + $0x60] sm:$0xff]  ;;  %v779_v6 = vld [vmem:[%s1650_s6 + $0x18] sm:$0xff]  ;;  %1323 = vset.pattern.permute.xlu0 %v1408_v27  ;;  %1325 = vset.pattern.permute.xlu1 %v1409_v28 }
  0x76   : > { %1143 = vmatpush1.bf16.msra.mxu0 %v1142_v12  ;;  %v695_v12 = vld [vmem:[#allocation4 + $0xe8] sm:$0xff]  ;;  %v510_v56 = vld [vmem:[%s1647_s3] sm:$0x3]  ;;  %v778_v5 = vld [vmem:[%s1650_s6 + $0x10] sm:$0xff] }
  0x77   : > { %1145 = vmatprep.subr.bf16.mxu0 %v1144_v18  ;;  %v381_v18 = vld [vmem:[%s1551_s25 + $0x18] sm:$0xff]  ;;  %v1248_v22 = vpack.c.bf16 %v695_v12, %v694_v11  ;;  %v491_v11 = vld [vmem:[#allocation2 + $0x368] sm:$0xff]  ;;  %v776_v63 = vld [vmem:[%s1650_s6] sm:$0xff] }
  0x78   : > { %v493_v12 = vld [vmem:[#allocation2 + $0x378] sm:$0xff] }
  0x79   : > { %1249 = vmatprep.subr.bf16.mxu1 %v1248_v22  ;;  %v496_v22 = vld [vmem:[#allocation2 + $0x390] sm:$0xff] }
  0x7a   : > { %1147 = vmatpush1.bf16.msra.mxu0 %v1146_v29  ;;  %v1170_v29 = vpack.c.bf16 %v456_v26, %v454_v25  ;;  %v1210_v25 = vpack.c.bf16 %v496_v22, %v494_v21  ;;  %v789_v21 = vld [vmem:[%s1650_s6 + $0x68] sm:$0xff] }
  0x7b   : > { %1149 = vmatprep.subr.bf16.mxu0 %v1148_v33  ;;  %v463_v33 = vld [vmem:[#allocation2 + $0x288] sm:$0xff] }
  0x7c   : > { %v1176_v36 = vpack.c.bf16 %v465_v34, %v463_v33  ;;  %v502_v33 = vld [vmem:[#allocation2 + $0x3c0] sm:$0xff]  ;;  %v504_v34 = vld [vmem:[#allocation2 + $0x3d0] sm:$0xff] }
  0x7e   : > { %1151 = vmatpush1.bf16.msra.mxu0 %v1150_v41  ;;  %v1178_v41 = vpack.c.bf16 %v464_v38, %v462_v37  ;;  %v1218_v37 = vpack.c.bf16 %v504_v34, %v502_v33 }
  0x7f   : > { %1153 = vmatprep.subr.bf16.mxu0 %v1152_v45  ;;  %v471_v45 = vld [vmem:[#allocation2 + $0x2c8] sm:$0xff] }
  0x80   : > { %v1184_v48 = vpack.c.bf16 %v473_v46, %v471_v45  ;;  %v1250_v45 = vpack.c.bf16 %v679_v44, %v678_v43  ;;  %v696_v46 = vld [vmem:[#allocation4 + $0xf0] sm:$0xff] }
  0x82   : > { %1155 = vmatpush1.bf16.msra.mxu0 %v1154_v53  ;;  %v1186_v53 = vpack.c.bf16 %v472_v50, %v470_v49  ;;  %1251 = vmatpush3.bf16.msra.mxu1 %v1250_v45  ;;  %v680_v49 = vld [vmem:[#allocation4 + $0x70] sm:$0xff]  ;;  %v681_v50 = vld [vmem:[#allocation4 + $0x78] sm:$0xff] }
  0x83   : > { %1157 = vmatprep.subr.bf16.mxu0 %v1156_v57  ;;  %v479_v57 = vld [vmem:[#allocation2 + $0x308] sm:$0xff]  ;;  %v1254_v51 = vpack.c.bf16 %v681_v50, %v680_v49 }
  0x84   : > { %v1192_v60 = vpack.c.bf16 %v481_v58, %v479_v57 }
  0x86   : > { %1159 = vmatpush1.bf16.msra.mxu0 %v1158_v1  ;;  %v1194_v1 = vpack.c.bf16 %v480_v62, %v478_v61 }
  0x87   : > { %1161 = vmatprep.subr.bf16.mxu0 %v1160_v3  ;;  %v482_v3 = vld [vmem:[#allocation2 + $0x320] sm:$0xff] }
  0x88   : > { %v1198_v7 = vpack.c.bf16 %v484_v4, %v482_v3  ;;  %v1257_v3 = vpack.c.bf16 %v777_v0, %v776_v63 }
  0x89   : > { %587 = vmatmul.mubr.f32.vlgmr.msra.gmra.mrb[0].mxu0 %v378_v13  ;;  %v1202_v13 = vpack.c.bf16 %v488_v10, %v486_v9  ;;  %v781_v9 = vld [vmem:[%s1650_s6 + $0x28] sm:$0xff] }
  0x8a   : > { %1163 = vmatpush1.bf16.msra.mxu0 %v1162_v14  ;;  %657 = vmatprep.mubr.f32.mxu0 %v381_v18  ;;  %v1204_v14 = vpack.c.bf16 %v493_v12, %v491_v11  ;;  %v497_v18 = vld [vmem:[#allocation2 + $0x398] sm:$0xff]  ;;  %v782_v11 = vld [vmem:[%s1650_s6 + $0x30] sm:$0xff] }
  0x8b   : > { %1165 = vmatprep.subr.bf16.mxu0 %v1164_v15  ;;  %v490_v15 = vld [vmem:[#allocation2 + $0x360] sm:$0xff]  ;;  %v1208_v20 = vpack.c.bf16 %v497_v18, %v495_v17  ;;  %v783_v12 = vld [vmem:[%s1650_s6 + $0x38] sm:$0xff]  ;;  %v786_v17 = vld [vmem:[%s1650_s6 + $0x50] sm:$0xff] }
  0x8c   : > { %v1206_v19 = vpack.c.bf16 %v492_v16, %v490_v15  ;;  %v785_v15 = vld [vmem:[%s1650_s6 + $0x48] sm:$0xff]  ;;  %v787_v18 = vld [vmem:[%s1650_s6 + $0x58] sm:$0xff] }
  0x8e   : > { %1167 = vmatpush1.bf16.msra.mxu0 %v1166_v23  ;;  %v499_v23 = vld [vmem:[#allocation2 + $0x3a8] sm:$0xff] }
  0x8f   : > { %1169 = vmatprep.subr.bf16.mxu0 %v1168_v24  ;;  %v501_v24 = vld [vmem:[#allocation2 + $0x3b8] sm:$0xff] }
  0x90   : > { %v1212_v26 = vpack.c.bf16 %v501_v24, %v499_v23  ;;  %v790_v23 = vld [vmem:[%s1650_s6 + $0x70] sm:$0xff]  ;;  %v791_v24 = vld [vmem:[%s1650_s6 + $0x78] sm:$0xff] }
  0x92   : > { %1171 = vmatpush1.bf16.msra.mxu0 %v1170_v29  ;;  %v503_v29 = vld [vmem:[#allocation2 + $0x3c8] sm:$0xff] }
  0x93   : > { %1173 = vmatprep.subr.bf16.mxu0 %v1172_v30  ;;  %v505_v30 = vld [vmem:[#allocation2 + $0x3d8] sm:$0xff] }
  0x94   : > { %v1216_v32 = vpack.c.bf16 %v505_v30, %v503_v29  ;;  %v1410_v30 = vmov 1  }
  0x96   : > { %1175 = vmatpush1.bf16.msra.mxu0 %v1174_v35  ;;  %v507_v35 = vld [vmem:[#allocation2 + $0x3e8] sm:$0xff] }
  0x97   : > { %1177 = vmatprep.subr.bf16.mxu0 %v1176_v36  ;;  %v509_v36 = vld [vmem:[#allocation2 + $0x3f8] sm:$0xff] }
  0x98   : > { %v1220_v38 = vpack.c.bf16 %v509_v36, %v507_v35 }
  0x9a   : > { %1179 = vmatpush1.bf16.msra.mxu0 %v1178_v41  ;;  %v1222_v41 = vpack.c.bf16 %v508_v40, %v506_v39 }
  0x9b   : > { %1181 = vmatprep.subr.bf16.mxu0 %v1180_v42  ;;  %v380_v42 = vld [vmem:[%s1551_s25 + $0x10] sm:$0xff]  ;;  %s373_s25 = scalar_lea.vmem %s1645_s1, %s1002_s13 }
  0x9c   : > { %v869_v29 = vld [vmem:[%s373_s25] sm:$0xff] }
  0x9d   : > { %873 = vperm.xlu0 %1323, %v869_v29   ;;  %893 = vperm.xlu1 %1325, %v869_v29  }
  0x9e   : > { %1183 = vmatpush1.bf16.msra.mxu0 %v1182_v47  ;;  %v697_v47 = vld [vmem:[#allocation4 + $0xf8] sm:$0xff] }
  0x9f   : > { %1185 = vmatprep.subr.bf16.mxu0 %v1184_v48  ;;  %v1252_v48 = vpack.c.bf16 %v697_v47, %v696_v46 }
  0xa1   : > { %1253 = vmatprep.subr.bf16.mxu1 %v1252_v48  ;;  %1324 = vset.pattern.permute.xlu0 %v1410_v30 }
  0xa2   : > { %1187 = vmatpush1.bf16.msra.mxu0 %v1186_v53  ;;  %1255 = vmatpush3.bf16.msra.mxu1 %v1254_v51  ;;  %v512_v53 = vlaneseq }
  0xa3   : > { %1189 = vmatprep.subr.bf16.mxu0 %v1188_v54  ;;  %1256 = vmatprep.subr.bf16.mxu1 %v1405_v52 }
  0xa4   : > { %v1557_v54 = vshrl.u32 %v512_v53, 7  ;;  %883 = vperm.xlu0 %1324, %v869_v29  }
  0xa6   : > { %1191 = vmatpush1.bf16.msra.mxu0 %v1190_v59  ;;  %v514_v55 = vsub.s32 0, %v1557_v54  ;;  %v518_v57 = vsub.s32 1, %v1557_v54  ;;  %v898_v39 = vsub.s32 2, %v1557_v54 }
  0xa7   : > { %1193 = vmatprep.subr.bf16.mxu0 %v1192_v60 }
  0xa8   : > { %v515_v58 = vrot.slane %v510_v56, %v514_v55  ;;  %v519_v59 = vrot.slane %v510_v56, %v518_v57  ;;  %1326 = vset.pattern.permute.xlu0 %v1409_v28 }
  0xaa   : > { %1195 = vmatpush1.bf16.msra.mxu0 %v1194_v1 }
  0xab   : > { %1197 = vmatprep.subr.bf16.mxu0 %v1196_v2 }
  0xae   : > { %1199 = vmatpush1.bf16.msra.mxu0 %v1198_v7  ;;  %v1260_v7 = vpack.c.bf16 %v779_v6, %v778_v5 }
  0xaf   : > { %1201 = vmatprep.subr.bf16.mxu0 %v1200_v8  ;;  %v780_v8 = vld [vmem:[%s1650_s6 + $0x20] sm:$0xff] }
  0xb0   : > { %v1263_v10 = vpack.c.bf16 %v781_v9, %v780_v8 }
  0xb2   : > { %1203 = vmatpush1.bf16.msra.mxu0 %v1202_v13  ;;  %v1266_v13 = vpack.c.bf16 %v783_v12, %v782_v11 }
  0xb3   : > { %1205 = vmatprep.subr.bf16.mxu0 %v1204_v14  ;;  %v784_v14 = vld [vmem:[%s1650_s6 + $0x40] sm:$0xff] }
  0xb4   : > { %v1269_v16 = vpack.c.bf16 %v785_v15, %v784_v14 }
  0xb6   : > { %1207 = vmatpush1.bf16.msra.mxu0 %v1206_v19  ;;  %v1272_v19 = vpack.c.bf16 %v787_v18, %v786_v17 }
  0xb7   : > { %1209 = vmatprep.subr.bf16.mxu0 %v1208_v20  ;;  %v788_v20 = vld [vmem:[%s1650_s6 + $0x60] sm:$0xff] }
  0xb8   : > { %v1275_v22 = vpack.c.bf16 %v789_v21, %v788_v20 }
  0xba   : > { %1211 = vmatpush1.bf16.msra.mxu0 %v1210_v25  ;;  %v1278_v25 = vpack.c.bf16 %v791_v24, %v790_v23 }
  0xbb   : > { %1213 = vmatprep.subr.bf16.mxu0 %v1212_v26  ;;  %v1407_v26 = vmov 0.0  }
  0xbe   : > { %1215 = vmatpush1.bf16.msra.mxu0 %v1214_v31 }
  0xbf   : > { %1217 = vmatprep.subr.bf16.mxu0 %v1216_v32  ;;  %v1004_v32 = vld [vmem:[%s1649_s5] ss:$0 sm:$0xff] }
  0xc2   : > { %1219 = vmatpush1.bf16.msra.mxu0 %v1218_v37 }
  0xc3   : > { %1221 = vmatprep.subr.bf16.mxu0 %v1220_v38  ;;  %v870_v38 = vld [vmem:[%s1651_s7] sm:$0x7] }
  0xc4   : > { %v879_v40 = vrot.slane %v870_v38, %v514_v55  ;;  %v899_v44 = vrot.slane %v870_v38, %v898_v39 }
  0xc6   : > { %1223 = vmatpush1.bf16.msra.mxu0 %v1222_v41  ;;  %v889_v41 = vrot.slane %v870_v38, %v518_v57 }
  0xc9   : > { %658 = vmatmul.mubr.f32.vlgmr.msra.gmra.mrb[0].mxu0 %v380_v42  ;;  %v1005_v42 = vld [vmem:[%s1652_s8] ss:$0 sm:$0xff] }
 0x11c   : > { %v874_v37 = vpop.permute.xlu0 %873  ;;  %v894_v46 = vpop.permute.xlu1 %893 }
 0x11d   : > { %v880_v47 = vmul.f32 %v879_v40, %v874_v37 }
 0x123   : > { %v884_v43 = vpop.permute.xlu0 %883 }
 0x124   : > { %v890_v50 = vmul.f32 %v889_v41, %v884_v43 }
 0x19c   : > { %v659_v60 = vpop.f32.mrb[0].mxu0 }
 0x19d   : > { %v1280_v61 = vadd.f32 %v659_v60, %v515_v58  ;;  %v661_v62 = vpop.f32.mrb[1].mxu0 }
 0x19e   : > { %v1281_v1 = vadd.f32 %v661_v62, %v519_v59 }
 0x19f   : > { %v664_v4 = vmax.f32 %v1280_v61, 0.0 }
 0x1a0   : > { %v665_v2 = vmax.f32 %v1281_v1, 0.0 }
 0x1a2   : > { %769 = vmatprep.mubr.f32.mxu1 %v665_v2 }
 0x1a3   : > { %770 = vmatmul.mubr.f32.vlgmr.msra.gmra.mrb[0].mxu1 %v664_v4 }
 0x1a4   : > { %1258 = vmatpush3.bf16.msra.mxu1 %v1257_v3  ;;  %1093 = vmatprep.mubr.msk.f32.mxu1 %vm1406_vm0, %v1407_v26 }
 0x1a5   : > { %1259 = vmatprep.subr.bf16.mxu1 %v1405_v52 }
 0x1a8   : > { %1261 = vmatpush3.bf16.msra.mxu1 %v1260_v7 }
 0x1a9   : > { %1262 = vmatprep.subr.bf16.mxu1 %v1405_v52 }
 0x1ac   : > { %1264 = vmatpush3.bf16.msra.mxu1 %v1263_v10 }
 0x1ad   : > { %1265 = vmatprep.subr.bf16.mxu1 %v1405_v52 }
 0x1b0   : > { %1267 = vmatpush3.bf16.msra.mxu1 %v1266_v13 }
 0x1b1   : > { %1268 = vmatprep.subr.bf16.mxu1 %v1405_v52 }
 0x1b4   : > { %1270 = vmatpush3.bf16.msra.mxu1 %v1269_v16 }
 0x1b5   : > { %1271 = vmatprep.subr.bf16.mxu1 %v1405_v52 }
 0x1b8   : > { %1273 = vmatpush3.bf16.msra.mxu1 %v1272_v19 }
 0x1b9   : > { %1274 = vmatprep.subr.bf16.mxu1 %v1405_v52 }
 0x1bc   : > { %1276 = vmatpush3.bf16.msra.mxu1 %v1275_v22 }
 0x1bd   : > { %1277 = vmatprep.subr.bf16.mxu1 %v1405_v52  ;;  %v900_v52 = vmul.f32 %v899_v44, %v894_v46 }
 0x1c0   : > { %1279 = vmatpush3.bf16.msra.mxu1 %v1278_v25 }
 0x276   : > { %v1041_v31 = vpop.f32.mrb[0].mxu1 }
 0x277   : > { %v1042_v33 = vpop.f32.mrb[1].mxu1 }
 0x278   : > { %v1043_v34 = vadd.f32 %v1042_v33, %v1041_v31 }
 0x27a   : > { %v772_v35 = vadd.f32 %v1043_v34, %v1004_v32 }
 0x27c   : > { %v775_v36 = vmax.f32 %v772_v35, 0.0 }
 0x27e   : > { %1094 = vmatmul.mubr.f32.vlgmr.msra.gmra.mrb[2].mxu1 %v775_v36 }
 0x351   : > { %v865_v45 = vpop.f32.mrb[2].mxu1 }
 0x352   : > { %v866_v48 = vadd.f32 %v1005_v42, %v865_v45  ;;  %v1095_v49 = vpop.f32.mrb[3].mxu1 }
 0x354   : > { %v881_v51 = vadd.f32 %v880_v47, %v866_v48 }
 0x356   : > { %v891_v53 = vadd.f32 %v890_v50, %v881_v51 }
 0x358   : > { %v901_v54 = vadd.f32 %v900_v52, %v891_v53 }
 0x35a   : > { %903 = vst.msk [vmem:[%s377_s19] sm:$0xff] %vm902_vm1, %v901_v54 }
 0x35b PF: > { %s21_s30 = sadd.s32 1, %s1397_s30  }
 0x35c   : > { %p18_p9 = scmp.ge.s32.totalorder %s21_s30, 5  }
 0x35e   :  { %20 = sbr.rel (!%p18_p9) target bundleno = 2 (0x2), region = 98 }
 0x365   :  { %923 = vsyncpa [#allocation3], 1 }
 0x366   :  { %925 = vsyncpa [#allocation3 + $0x1], 1 }
 0x367   :  { %926 = vsyncpa [#allocation5], 1 }

</bundles_post_ra>
